<compile_context>
chip_gen: v7x
topology: tpu7x:2x2x1
jax: 0.10.0
libtpu: 0.0.40
codegen_flags: <defaults>
</compile_context>

<pallas_src>
import jax
import jax.numpy as jnp
from jax.experimental import pallas as pl
from jax.experimental.pallas import tpu as pltpu

MSE_W, COS_W, SSIM_W = 0.4, 0.4, 0.2
EPS = 1e-8  # PyTorch CosineSimilarity default eps


def _recon_loss_kernel(pred_ref, gt_ref, cos_ref, sse_ref):
    pred = pred_ref[...].astype(jnp.float32)   # (N, C, TS)
    gt = gt_ref[...].astype(jnp.float32)

    # Per-tile partial sum of squared error; combined into the global MSE
    # outside the kernel (one tiny lane-aligned block per grid step).
    d = pred - gt
    sse = jnp.sum(d * d)
    sse_ref[...] = jnp.full(sse_ref.shape, sse, dtype=jnp.float32)

    # Cosine similarity along the channel axis (PyTorch dim=1).
    dot = jnp.sum(pred * gt, axis=1)                                   # (N, TS)
    pn = jnp.maximum(jnp.sqrt(jnp.sum(pred * pred, axis=1)), EPS)      # (N, TS)
    gn = jnp.maximum(jnp.sqrt(jnp.sum(gt * gt, axis=1)), EPS)          # (N, TS)
    cos = dot * pl.reciprocal(pn * gn, approx=False)
    cos_ref[...] = ((COS_W + SSIM_W) * jnp.abs(cos)).astype(cos_ref.dtype)


def _choose_spatial_tile(N, C, S, in_itemsize, budget_bytes):
    """Largest spatial tile (multiple of 128, dividing S) fitting the VMEM budget."""
    # Per spatial element per grid step: 2 inputs x 2 pipeline buffers + cos out.
    per_elem = 2 * (2 * N * C * in_itemsize) + 2 * (N * 4)
    max_ts = max(128, budget_bytes // max(per_elem, 1))
    if S <= max_ts:
        return S
    if S % 128 != 0:
        # TODO(synk): pad/mask ragged spatial extents instead of one big block.
        return S
    ts = (max_ts // 128) * 128
    while ts >= 128:
        if S % ts == 0:
            return ts
        ts -= 128
    return S


def reconstruction_loss(pred, gt, *, vmem_budget_bytes=12 * 1024 * 1024):
    N, C, H, W = pred.shape
    S = H * W
    pred2 = pred.reshape(N, C, S)   # free: contiguous reshape, lane dim = S
    gt2 = gt.reshape(N, C, S)

    ts = _choose_spatial_tile(N, C, S, jnp.dtype(pred.dtype).itemsize,
                              vmem_budget_bytes)
    n_tiles = S // ts

    cos_part, sse_part = pl.pallas_call(
        _recon_loss_kernel,
        out_shape=(
            jax.ShapeDtypeStruct((N, S), jnp.float32),
            jax.ShapeDtypeStruct((n_tiles, 8, 128), jnp.float32),
        ),
        grid_spec=pltpu.PrefetchScalarGridSpec(
            num_scalar_prefetch=0,
            grid=(n_tiles,),
            in_specs=[
                pl.BlockSpec((N, C, ts), lambda s: (0, 0, s)),
                pl.BlockSpec((N, C, ts), lambda s: (0, 0, s)),
            ],
            out_specs=[
                pl.BlockSpec((N, ts), lambda s: (0, s)),
                pl.BlockSpec((1, 8, 128), lambda s: (s, 0, 0)),
            ],
        ),
        compiler_params=pltpu.CompilerParams(
            dimension_semantics=("parallel",),
            vmem_limit_bytes=32 * 1024 * 1024,
        ),
    )(pred2, gt2)

    inv_total = 1.0 / float(N * C * S)
    mse = jnp.sum(sse_part[:, 0, 0]) * inv_total          # sum of per-tile partials
    loss = MSE_W * jnp.abs(mse) + cos_part                 # cos_part = 0.6*|cos|
    return loss.reshape(N, H, W)


def _reference(pred, gt):
    p = pred.astype(jnp.float32)
    g = gt.astype(jnp.float32)
    mse = jnp.mean((p - g) ** 2)
    dot = jnp.sum(p * g, axis=1)
    pn = jnp.maximum(jnp.sqrt(jnp.sum(p * p, axis=1)), EPS)
    gn = jnp.maximum(jnp.sqrt(jnp.sum(g * g, axis=1)), EPS)
    cos = dot / (pn * gn)
    return MSE_W * jnp.abs(mse) + (COS_W + SSIM_W) * jnp.abs(cos)


if __name__ == "__main__":
    key = jax.random.PRNGKey(0)
    k1, k2 = jax.random.split(key)
    N, C, H, W = 2, 4, 16, 16
    pred = jax.random.normal(k1, (N, C, H, W), dtype=jnp.float32)
    gt = jax.random.normal(k2, (N, C, H, W), dtype=jnp.float32)

    out = jax.block_until_ready(reconstruction_loss(pred, gt))
    ref = _reference(pred, gt)

    assert out.shape == (N, H, W)
    assert jnp.allclose(out, ref, atol=1e-5, rtol=1e-5), "kernel/reference mismatch"
    print("KERNEL_OK")
</pallas_src>

<mosaic_0001>
module attributes {stable_mosaic.version = 11 : i64} {
  func.func @_recon_loss_kernel(%arg0: i32, %arg1: memref<2x4x256xf32, #tpu.memory_space<vmem>>, %arg2: memref<2x4x256xf32, #tpu.memory_space<vmem>>, %arg3: memref<2x256xf32, #tpu.memory_space<vmem>>, %arg4: memref<1x8x128xf32, #tpu.memory_space<vmem>>) attributes {dimension_semantics = [#tpu.dimension_semantics<parallel>], iteration_bounds = array<i64: 1>, scalar_prefetch = 0 : i64, scratch_operands = 0 : i64, tpu.core_type = #tpu.core_type<tc>, window_params = [{transform_indices = @transform_0, window_bounds = array<i64: 2, 4, 256>}, {transform_indices = @transform_1, window_bounds = array<i64: 2, 4, 256>}, {transform_indices = @transform_2, window_bounds = array<i64: 2, 256>}, {transform_indices = @transform_3, window_bounds = array<i64: 1, 8, 128>}]} {
    %c0 = arith.constant 0 : index
    %c0_0 = arith.constant 0 : index
    %c0_1 = arith.constant 0 : index
    %0 = vector.load %arg1[%c0, %c0_0, %c0_1] : memref<2x4x256xf32, #tpu.memory_space<vmem>>, vector<2x4x256xf32>
    %c0_2 = arith.constant 0 : index
    %c0_3 = arith.constant 0 : index
    %c0_4 = arith.constant 0 : index
    %1 = vector.load %arg2[%c0_2, %c0_3, %c0_4] : memref<2x4x256xf32, #tpu.memory_space<vmem>>, vector<2x4x256xf32>
    %2 = arith.subf %0, %1 : vector<2x4x256xf32>
    %3 = arith.mulf %2, %2 : vector<2x4x256xf32>
    %4 = vector.shape_cast %3 : vector<2x4x256xf32> to vector<1x2x4x256xf32>
    %cst = arith.constant dense<0.000000e+00> : vector<1xf32>
    %5 = vector.multi_reduction <add>, %4, %cst [1, 2, 3] : vector<1x2x4x256xf32> to vector<1xf32>
    %6 = vector.shape_cast %5 : vector<1xf32> to vector<1x1x1x1xf32>
    %7 = vector.extract %6[0, 0, 0, 0] : f32 from vector<1x1x1x1xf32>
    %8 = vector.broadcast %7 : f32 to vector<1x8x128xf32>
    %c0_5 = arith.constant 0 : index
    %c0_6 = arith.constant 0 : index
    %c0_7 = arith.constant 0 : index
    %9 = vector.load %arg4[%c0_5, %c0_6, %c0_7] : memref<1x8x128xf32, #tpu.memory_space<vmem>>, vector<1x8x128xf32>
    tpu.vector_store %arg4[%c0_5, %c0_6, %c0_7], %8 {strides = array<i32>} : memref<1x8x128xf32, #tpu.memory_space<vmem>>, vector<1x8x128xf32>,
    %10 = arith.mulf %0, %1 : vector<2x4x256xf32>
    %cst_8 = arith.constant dense<0.000000e+00> : vector<2x256xf32>
    %11 = vector.multi_reduction <add>, %10, %cst_8 [1] : vector<2x4x256xf32> to vector<2x256xf32>
    %12 = arith.mulf %0, %0 : vector<2x4x256xf32>
    %cst_9 = arith.constant dense<0.000000e+00> : vector<2x256xf32>
    %13 = vector.multi_reduction <add>, %12, %cst_9 [1] : vector<2x4x256xf32> to vector<2x256xf32>
    %14 = math.sqrt %13 : vector<2x256xf32>
    %cst_10 = arith.constant 9.99999993E-9 : f32
    %15 = vector.broadcast %cst_10 : f32 to vector<2x256xf32>
    %16 = arith.maximumf %14, %15 : vector<2x256xf32>
    %17 = arith.mulf %1, %1 : vector<2x4x256xf32>
    %cst_11 = arith.constant dense<0.000000e+00> : vector<2x256xf32>
    %18 = vector.multi_reduction <add>, %17, %cst_11 [1] : vector<2x4x256xf32> to vector<2x256xf32>
    %19 = math.sqrt %18 : vector<2x256xf32>
    %cst_12 = arith.constant 9.99999993E-9 : f32
    %20 = vector.broadcast %cst_12 : f32 to vector<2x256xf32>
    %21 = arith.maximumf %19, %20 : vector<2x256xf32>
    %22 = arith.mulf %16, %21 : vector<2x256xf32>
    %23 = tpu.reciprocal %22 : vector<2x256xf32> -> vector<2x256xf32>
    %24 = arith.mulf %11, %23 : vector<2x256xf32>
    %25 = math.absf %24 : vector<2x256xf32>
    %cst_13 = arith.constant 6.000000e-01 : f32
    %26 = vector.broadcast %cst_13 : f32 to vector<2x256xf32>
    %27 = arith.mulf %26, %25 : vector<2x256xf32>
    %c0_14 = arith.constant 0 : index
    %c0_15 = arith.constant 0 : index
    %28 = vector.load %arg3[%c0_14, %c0_15] : memref<2x256xf32, #tpu.memory_space<vmem>>, vector<2x256xf32>
    tpu.vector_store %arg3[%c0_14, %c0_15], %27 {strides = array<i32>} : memref<2x256xf32, #tpu.memory_space<vmem>>, vector<2x256xf32>,
    return
  }
  func.func @transform_0(%arg0: i32) -> (i32, i32, i32) {
    %c0_i32 = arith.constant 0 : i32
    %c0_i32_0 = arith.constant 0 : i32
    %c0_i32_1 = arith.constant 0 : i32
    return %c0_i32, %c0_i32_0, %arg0 : i32, i32, i32
  }
  func.func @transform_1(%arg0: i32) -> (i32, i32, i32) {
    %c0_i32 = arith.constant 0 : i32
    %c0_i32_0 = arith.constant 0 : i32
    %c0_i32_1 = arith.constant 0 : i32
    return %c0_i32, %c0_i32_0, %arg0 : i32, i32, i32
  }
  func.func @transform_2(%arg0: i32) -> (i32, i32) {
    %c0_i32 = arith.constant 0 : i32
    %c0_i32_0 = arith.constant 0 : i32
    return %c0_i32, %arg0 : i32, i32
  }
  func.func @transform_3(%arg0: i32) -> (i32, i32, i32) {
    %c0_i32 = arith.constant 0 : i32
    %c0_i32_0 = arith.constant 0 : i32
    %c0_i32_1 = arith.constant 0 : i32
    return %arg0, %c0_i32, %c0_i32_0 : i32, i32, i32
  }
}

</mosaic_0001>

<bundles_post_ra>
// kernel: tpu_custom_call.1
= control target key start
LH: loop header
LB: loop body
LE: loop exit
PB: predicated region body
PF: predicated region fallthrough
CT: control target
= control target key end

     0   :  { %9 = vsyncpa [#allocation3], 0  ;;  %s653_s0 = inlined_call_operand.hbm [shape: f32[2,4,256], index: 0, kind: input, shape index: {}]   ;;  %s654_s1 = inlined_call_operand.hbm [shape: f32[2,4,256], index: 1, kind: input, shape index: {}]   ;;  %s655_s2 = inlined_call_operand.hbm [shape: f32[2,256], index: 2, kind: output, shape index: {0}]   ;;  %s656_s3 = inlined_call_operand.hbm [shape: f32[1,8,128], index: 3, kind: output, shape index: {1}]  }
   0x1   :  { %10 = vsyncpa [#allocation6], 0 }
   0x2   :  { %11 = vsyncpa [#allocation4], 0 }
   0x3   :  { %12 = vsyncpa [#allocation9], 0  ;;  %s462_s12 = smov [#allocation2]   ;;  %s366_s16 = scalar_lea.hbm %s653_s0, 256 }
   0x4   :  { %s18_s13 = sshll.u32 %s462_s12, 4  ;;  %p367_p0 = scmp.ne.s32.totalorder %s653_s0, %s366_s16  ;;  %s19_s13 = int_to_ptr.vmem [resolvable:$true] %s18_s13 }
   0x5   :  { %p370_p1 = scmp.lt.u32.totalorder %s366_s16, %s653_s0 }
   0x7   :  { %p372_p2 = pnand %p370_p1, %p367_p0 }
   0x9   :  { %375 = shalt.err (!%p372_p2)
}
   0xa   :  { %s376_s21 = scalar_lea.vmem %s19_s13, 256  ;;  %p381_p4 = scmp.lt.s32.totalorder %s19_s13, %s19_s13 }
   0xb   :  { %p377_p3 = scmp.ne.s32.totalorder %s19_s13, %s376_s21  ;;  %p382_p5 = scmp.lt.s32.totalorder %s376_s21, %s376_s21 }
   0xd   :  { %p383_p6 = por %p382_p5, %p381_p4 }
   0xf   :  { %p384_p7 = pnand %p383_p6, %p377_p3 }
  0x11   :  { %387 = shalt.err (!%p384_p7)
}
  0x12   :  { %s463_s22 = smov 128   ;;  %s464_s23 = smov 8  }
  0x13   :  { %24 = dma.hbm_to_vmem [thread:$0]  %s653_s0, 256, %s19_s13, [#allocation3], %s463_s22, %s463_s22, %s464_s23  }
  0x14   :  { %s465_s26 = smov [#allocation5]   ;;  %s388_s30 = scalar_lea.hbm %s654_s1, 256 }
  0x15   :  { %s30_s27 = sshll.u32 %s465_s26, 4  ;;  %p389_p8 = scmp.ne.s32.totalorder %s654_s1, %s388_s30  ;;  %s31_s27 = int_to_ptr.vmem [resolvable:$true] %s30_s27 }
  0x16   :  { %p392_p9 = scmp.lt.u32.totalorder %s388_s30, %s654_s1 }
  0x18   :  { %p394_p10 = pnand %p392_p9, %p389_p8 }
  0x1a   :  { %397 = shalt.err (!%p394_p10)
}
  0x1b   :  { %s398_s8 = scalar_lea.vmem %s31_s27, 256  ;;  %p403_p12 = scmp.lt.s32.totalorder %s31_s27, %s31_s27 }
  0x1c   :  { %p399_p11 = scmp.ne.s32.totalorder %s31_s27, %s398_s8  ;;  %p404_p13 = scmp.lt.s32.totalorder %s398_s8, %s398_s8 }
  0x1e   :  { %p405_p0 = por %p404_p13, %p403_p12 }
  0x20   :  { %p406_p1 = pnand %p405_p0, %p399_p11 }
  0x22   :  { %409 = shalt.err (!%p406_p1)
}
  0x23   :  { %36 = dma.hbm_to_vmem [thread:$0]  %s654_s1, 256, %s31_s27, [#allocation6], %s463_s22, %s463_s22, %s464_s23  }
  0x24   :  { %454 = dma.done.wait [#allocation3], 256  }
  0x25   :  { %455 = vsyncadd [#allocation3], 4294967040 }
  0x26   :  { %456 = dma.done.wait [#allocation6], 256  }
  0x27   :  { %457 = vsyncadd [#allocation6], 4294967040  ;;  %v43_v0 = vld [vmem:[#allocation2] sm:$0xff]  ;;  %v513_v1 = vld [vmem:[#allocation2 + $0x8] sm:$0xff]  ;;  %vm57_vm0 = vcmask 1043456   ;;  %s467_s1 = smov [#allocation7]  }
  0x28   :  { %v45_v2 = vld [vmem:[#allocation5] sm:$0xff]  ;;  %v515_v3 = vld [vmem:[#allocation5 + $0x8] sm:$0xff]  ;;  %v112_v10 = vmul.f32 %v43_v0, %v43_v0  ;;  %v113_v16 = vmul.f32 %v513_v1, %v513_v1  ;;  %s309_s10 = sshll.u32 %s467_s1, 4  ;;  %s310_s10 = int_to_ptr.vmem [resolvable:$true] %s309_s10 }
  0x29   :  { %v47_v4 = vsub.f32 %v43_v0, %v45_v2  ;;  %v76_v5 = vmul.f32 %v45_v2, %v43_v0  ;;  %v48_v6 = vsub.f32 %v513_v1, %v515_v3  ;;  %v180_v28 = vmul.f32 %v45_v2, %v45_v2  ;;  %s410_s11 = scalar_lea.vmem %s310_s10, 64  ;;  %p415_p3 = scmp.lt.s32.totalorder %s310_s10, %s310_s10 }
  0x2a   :  { %v116_v19 = vcombine.high %v112_v10, %v112_v10  ;;  %v117_v23 = vcombine.high %v113_v16, %v113_v16  ;;  %v120_v24 = vsel %vm57_vm0, %v112_v10, 0.0  ;;  %v134_v27 = vsel %vm57_vm0, %v113_v16, 0.0  ;;  %p411_p2 = scmp.ne.s32.totalorder %s310_s10, %s410_s11  ;;  %p416_p4 = scmp.lt.s32.totalorder %s410_s11, %s410_s11 }
  0x2b   :  { %v49_v7 = vmul.f32 %v47_v4, %v47_v4  ;;  %v80_v8 = vcombine.high %v76_v5, %v76_v5  ;;  %v520_v9 = vsel %vm57_vm0, %v76_v5, 0.0  ;;  %v50_v11 = vmul.f32 %v48_v6, %v48_v6 }
  0x2c   :  { %v127_v25 = vsel %vm57_vm0, %v116_v19, 0.0  ;;  %v121_v29 = vrot.slane %v120_v24, 4  ;;  %v181_v30 = vmul.f32 %v515_v3, %v515_v3  ;;  %v141_v32 = vsel %vm57_vm0, %v117_v23, 0.0  ;;  %p417_p5 = por %p416_p4, %p415_p3 }
  0x2d   :  { %v53_v12 = vcombine.high %v49_v7, %v49_v7  ;;  %v58_v13 = vsel %vm57_vm0, %v49_v7, 0.0  ;;  %v524_v14 = vsel %vm57_vm0, %v80_v8, 0.0  ;;  %v54_v15 = vcombine.high %v50_v11, %v50_v11 }
  0x2e   :  { %v61_v18 = vsel %vm57_vm0, %v50_v11, 0.0  ;;  %v128_v31 = vrot.slane %v127_v25, 4  ;;  %v135_v33 = vrot.slane %v134_v27, 4  ;;  %v142_v34 = vrot.slane %v141_v32, 4  ;;  %p418_p6 = pnand %p417_p5, %p411_p2 }
  0x2f   :  { %v59_v17 = vsel %vm57_vm0, %v53_v12, 0.0  ;;  %v63_v21 = vsel %vm57_vm0, %v54_v15, 0.0  ;;  %v184_v35 = vcombine.high %v180_v28, %v180_v28  ;;  %v122_v36 = vadd.f32 %v121_v29, %v120_v24 }
  0x30   :  { %v60_v20 = vadd.f32 %v59_v17, %v58_v13  ;;  %v185_v37 = vcombine.high %v181_v30, %v181_v30  ;;  %v188_v38 = vsel %vm57_vm0, %v180_v28, 0.0  ;;  %v129_v39 = vadd.f32 %v128_v31, %v127_v25 }
  0x31   :  { %v189_v40 = vrot.slane %v188_v38, 4  ;;  %v195_v41 = vsel %vm57_vm0, %v184_v35, 0.0  ;;  %v136_v42 = vadd.f32 %v135_v33, %v134_v27  ;;  %v202_v44 = vsel %vm57_vm0, %v181_v30, 0.0 }
  0x32   :  { %v62_v22 = vadd.f32 %v61_v18, %v60_v20  ;;  %v196_v43 = vrot.slane %v195_v41, 4  ;;  %v143_v45 = vadd.f32 %v142_v34, %v141_v32  ;;  %v203_v46 = vrot.slane %v202_v44, 4 }
  0x33   :  { %v123_v47 = vrot.slane %v122_v36, 2  ;;  %v190_v48 = vadd.f32 %v189_v40, %v188_v38  ;;  %v209_v49 = vsel %vm57_vm0, %v185_v37, 0.0  ;;  %v130_v50 = vrot.slane %v129_v39, 2 }
  0x34   :  { %v64_v26 = vadd.f32 %v63_v21, %v62_v22  ;;  %v197_v51 = vadd.f32 %v196_v43, %v195_v41  ;;  %v137_v52 = vrot.slane %v136_v42, 2  ;;  %v144_v53 = vrot.slane %v143_v45, 2 }
  0x35   :  { %v204_v54 = vadd.f32 %v203_v46, %v202_v44  ;;  %v210_v55 = vrot.slane %v209_v49, 4  ;;  %v124_v56 = vadd.f32 %v123_v47, %v122_v36  ;;  %v191_v57 = vrot.slane %v190_v48, 2 }
  0x36   :  { %65 = vadd.xlane.f32.xlu0 %v64_v26  ;;  %v131_v58 = vadd.f32 %v130_v50, %v129_v39  ;;  %v198_v59 = vrot.slane %v197_v51, 2  ;;  %v138_v61 = vadd.f32 %v137_v52, %v136_v42  ;;  %v145_v63 = vadd.f32 %v144_v53, %v143_v45 }
  0x37   :  { %v211_v60 = vadd.f32 %v210_v55, %v209_v49  ;;  %v205_v62 = vrot.slane %v204_v54, 2  ;;  %v125_v0 = vrot.slane %v124_v56, 1  ;;  %v192_v2 = vadd.f32 %v191_v57, %v190_v48 }
  0x38   :  { %v132_v4 = vrot.slane %v131_v58, 1  ;;  %v199_v5 = vadd.f32 %v198_v59, %v197_v51  ;;  %v139_v7 = vrot.slane %v138_v61, 1  ;;  %v146_v10 = vrot.slane %v145_v63, 1 }
  0x39   :  { %v212_v6 = vrot.slane %v211_v60, 2  ;;  %v206_v8 = vadd.f32 %v205_v62, %v204_v54  ;;  %v541_v11 = vadd.f32 %v125_v0, %v124_v56  ;;  %v193_v12 = vrot.slane %v192_v2, 1 }
  0x3a   :  { %v543_v13 = vadd.f32 %v132_v4, %v131_v58  ;;  %v200_v15 = vrot.slane %v199_v5, 1  ;;  %v140_v17 = vadd.f32 %v139_v7, %v138_v61  ;;  %v545_v19 = vadd.f32 %v146_v10, %v145_v63 }
  0x3b   :  { %v213_v16 = vadd.f32 %v212_v6, %v211_v60  ;;  %v207_v18 = vrot.slane %v206_v8, 1  ;;  %342 = vrsqrt.f32 %v541_v11  ;;  %v548_v20 = vadd.f32 %v193_v12, %v192_v2 }
  0x3c   :  { %344 = vrsqrt.f32 %v543_v13  ;;  %v551_v21 = vadd.f32 %v200_v15, %v199_v5  ;;  %v77_v23 = vmul.f32 %v515_v3, %v513_v1  ;;  %v85_v28 = vrot.slane %v520_v9, 4 }
  0x3d   :  { %v214_v22 = vrot.slane %v213_v16, 1  ;;  %346 = vrsqrt.f32 %v140_v17  ;;  %v555_v24 = vadd.f32 %v207_v18, %v206_v8  ;;  %v92_v1 = vrot.slane %v524_v14, 4 }
  0x3e   :  { %348 = vrsqrt.f32 %v545_v19  ;;  %v98_v25 = vsel %vm57_vm0, %v77_v23, 0.0  ;;  %v81_v27 = vcombine.high %v77_v23, %v77_v23  ;;  %v569_v33 = vadd.f32 %v85_v28, %v520_v9 }
  0x3f   :  { %350 = vrsqrt.f32 %v548_v20  ;;  %v560_v26 = vadd.f32 %v214_v22, %v213_v16  ;;  %v99_v3 = vrot.slane %v98_v25, 4  ;;  %v572_v34 = vadd.f32 %v92_v1, %v524_v14 }
  0x40   :  { %352 = vrsqrt.f32 %v551_v21  ;;  %v105_v30 = vsel %vm57_vm0, %v81_v27, 0.0  ;;  %v87_v41 = vrot.slane %v569_v33, 2  ;;  %vm150_vm1 = vcmp.eq.f32.partialorder %v541_v11, inf }
  0x41   :  { %354 = vrsqrt.f32 %v555_v24  ;;  %v574_v35 = vadd.f32 %v99_v3, %v98_v25  ;;  %v106_v37 = vrot.slane %v105_v30, 4  ;;  %v94_v42 = vrot.slane %v572_v34, 2 }
  0x42   :  { %356 = vrsqrt.f32 %v560_v26  ;;  %v153_v9 = vand.u32 2147483648, %v541_v11  ;;  %vm218_vm2 = vcmp.eq.f32.partialorder %v548_v20, inf  ;;  %v221_v47 = vand.u32 2147483648, %v548_v20 }
  0x43   :  { %v101_v43 = vrot.slane %v574_v35, 2  ;;  %v579_v44 = vadd.f32 %v106_v37, %v105_v30  ;;  %vm164_vm3 = vcmp.eq.f32.partialorder %v140_v17, inf  ;;  %v167_v53 = vand.u32 2147483648, %v140_v17 }
  0x44   :  { %vm171_vm4 = vcmp.eq.f32.partialorder %v545_v19, inf  ;;  %v174_v54 = vand.u32 2147483648, %v545_v19  ;;  %vm166_vm5 = vcmp.eq.f32.partialorder %v140_v17, 0.0  ;;  %vm173_vm6 = vcmp.eq.f32.partialorder %v545_v19, 0.0 }
  0x45   :  { %v343_v29 = vpop.eup %342  ;;  %vm157_vm7 = vcmp.eq.f32.partialorder %v543_v13, inf  ;;  %v160_v57 = vand.u32 2147483648, %v543_v13  ;;  %vm152_vm8 = vcmp.eq.f32.partialorder %v541_v11, 0.0  ;;  %vm159_vm9 = vcmp.eq.f32.partialorder %v543_v13, 0.0 }
  0x46   :  { %v345_v31 = vpop.eup %344  ;;  %v149_v45 = vmul.f32 %v343_v29, %v541_v11  ;;  %vm220_vm10 = vcmp.eq.f32.partialorder %v548_v20, 0.0  ;;  %vm225_vm11 = vcmp.eq.f32.partialorder %v551_v21, inf  ;;  %vm227_vm12 = vcmp.eq.f32.partialorder %v551_v21, 0.0 }
  0x47   :  { %v347_v32 = vpop.eup %346  ;;  %v156_v46 = vmul.f32 %v345_v31, %v543_v13  ;;  %v228_v8 = vand.u32 2147483648, %v551_v21  ;;  %vm232_vm13 = vcmp.eq.f32.partialorder %v555_v24, inf  ;;  %vm234_vm14 = vcmp.eq.f32.partialorder %v555_v24, 0.0 }
  0x48   :  { %v349_v36 = vpop.eup %348  ;;  %v163_v14 = vmul.f32 %v347_v32, %v140_v17  ;;  %v151_v60 = vsel %vm150_vm1, %v541_v11, %v149_v45  ;;  %v235_v11 = vand.u32 2147483648, %v555_v24  ;;  %vm239_vm15 = vcmp.eq.f32.partialorder %v560_v26, inf }
  0x49   :  { %v351_v38 = vpop.eup %350  ;;  %v170_v52 = vmul.f32 %v349_v36, %v545_v19  ;;  %v158_v61 = vsel %vm157_vm7, %v543_v13, %v156_v46  ;;  %v154_v62 = vsel %vm152_vm8, %v153_v9, %v151_v60  ;;  %vm241_vm0 = vcmp.eq.f32.partialorder %v560_v26, 0.0 }
  0x4a   :  { %v353_v39 = vpop.eup %352  ;;  %v217_v49 = vmul.f32 %v351_v38, %v548_v20  ;;  %v165_v55 = vsel %vm164_vm3, %v140_v17, %v163_v14  ;;  %v161_v63 = vsel %vm159_vm9, %v160_v57, %v158_v61  ;;  %v176_v4 = vmax.f32 %v154_v62, 1e-08 }
  0x4b   :  { %v355_v40 = vpop.eup %354  ;;  %v224_v50 = vmul.f32 %v353_v39, %v551_v21  ;;  %v172_v56 = vsel %vm171_vm4, %v545_v19, %v170_v52  ;;  %v168_v58 = vsel %vm166_vm5, %v167_v53, %v165_v55  ;;  %v177_v5 = vmax.f32 %v161_v63, 1e-08 }
  0x4c   :  { %v357_v48 = vpop.eup %356  ;;  %v231_v51 = vmul.f32 %v355_v40, %v555_v24  ;;  %v175_v0 = vsel %vm173_vm6, %v174_v54, %v172_v56  ;;  %v178_v2 = vmax.f32 %v168_v58, 1e-08  ;;  %v219_v6 = vsel %vm218_vm2, %v548_v20, %v217_v49 }
  0x4d   :  { %v238_v59 = vmul.f32 %v357_v48, %v560_v26  ;;  %v222_v7 = vsel %vm220_vm10, %v221_v47, %v219_v6  ;;  %v226_v10 = vsel %vm225_vm11, %v551_v21, %v224_v50  ;;  %v242_v17 = vand.u32 2147483648, %v560_v26 }
  0x4e   :  { %v229_v12 = vsel %vm227_vm12, %v228_v8, %v226_v10  ;;  %v233_v13 = vsel %vm232_vm13, %v555_v24, %v231_v51  ;;  %v244_v18 = vmax.f32 %v222_v7, 1e-08  ;;  %v179_v19 = vmax.f32 %v175_v0, 1e-08 }
  0x4f   :  { %v236_v15 = vsel %vm234_vm14, %v235_v11, %v233_v13  ;;  %v240_v16 = vsel %vm239_vm15, %v560_v26, %v238_v59  ;;  %v245_v20 = vmax.f32 %v229_v12, 1e-08  ;;  %v108_v22 = vrot.slane %v579_v44, 2 }
  0x50   :  { %v246_v21 = vmax.f32 %v236_v15, 1e-08  ;;  %v243_v23 = vsel %vm241_vm0, %v242_v17, %v240_v16  ;;  %v248_v25 = vmul.f32 %v244_v18, %v176_v4  ;;  %v88_v27 = vadd.f32 %v87_v41, %v569_v33 }
  0x51   :  { %v247_v24 = vmax.f32 %v243_v23, 1e-08  ;;  %v249_v28 = vmul.f32 %v245_v20, %v177_v5  ;;  %v95_v3 = vadd.f32 %v94_v42, %v572_v34  ;;  %v102_v26 = vadd.f32 %v101_v43, %v574_v35 }
  0x52   :  { %v250_v1 = vmul.f32 %v246_v21, %v178_v2  ;;  %358 = vrcp.f32 %v248_v25  ;;  %v109_v30 = vadd.f32 %v108_v22, %v579_v44  ;;  %v89_v31 = vrot.slane %v88_v27, 1 }
  0x53   :  { %v251_v29 = vmul.f32 %v247_v24, %v179_v19  ;;  %360 = vrcp.f32 %v249_v28  ;;  %v96_v32 = vrot.slane %v95_v3, 1  ;;  %v103_v33 = vrot.slane %v102_v26, 1 }
  0x54   :  { %362 = vrcp.f32 %v250_v1  ;;  %v110_v36 = vrot.slane %v109_v30, 1  ;;  %v90_v37 = vadd.f32 %v89_v31, %v88_v27  ;;  %v466_v41 = vmov 1983009808  }
  0x55   :  { %364 = vrcp.f32 %v251_v29  ;;  %v97_v38 = vadd.f32 %v96_v32, %v95_v3  ;;  %v104_v39 = vadd.f32 %v103_v33, %v102_v26  ;;  %v274_v42 = vunpack.c.l.s4 %v466_v41 }
  0x56   :  { %v111_v34 = vadd.f32 %v110_v36, %v109_v30  ;;  %v276_v9 = vlaneseq  ;;  %vm293_vm1 = vcmask 1041409   ;;  %vm295_vm2 = vcmask 1043459  }
  0x57   :  { %v275_v50 = vunpack.c.0.s8 %v274_v42  ;;  %vm297_vm3 = vcmask 1045509   ;;  %vm299_vm4 = vcmask 1047559  }
  0x58   :  { %v277_v51 = vshrl.u32 %v276_v9, 7 }
  0x5a   :  { %v278_v59 = vsub.s32 %v275_v50, %v277_v51 }
  0x5c   :  { %v359_v40 = vpop.eup %358 }
  0x5d   :  { %v361_v14 = vpop.eup %360  ;;  %v256_v35 = vmul.f32 %v359_v40, %v90_v37 }
  0x5e   :  { %v363_v43 = vpop.eup %362  ;;  %v257_v45 = vmul.f32 %v361_v14, %v97_v38 }
  0x5f   :  { %v365_v46 = vpop.eup %364  ;;  %v258_v44 = vmul.f32 %v363_v43, %v104_v39  ;;  %v260_v47 = vand.u32 2147483647, %v256_v35 }
  0x60   :  { %v259_v48 = vmul.f32 %v365_v46, %v111_v34  ;;  %v261_v49 = vand.u32 2147483647, %v257_v45 }
  0x61   :  { %v262_v52 = vand.u32 2147483647, %v258_v44  ;;  %v264_v53 = vmul.f32 0.6, %v260_v47 }
  0x62   :  { %v263_v54 = vand.u32 2147483647, %v259_v48  ;;  %v265_v55 = vmul.f32 0.6, %v261_v49 }
  0x63   :  { %v266_v56 = vmul.f32 0.6, %v262_v52 }
  0x64   :  { %v267_v57 = vmul.f32 0.6, %v263_v54  ;;  %v272_v58 = vcombine.low %v264_v53, %v265_v55 }
  0x66   :  { %v280_v60 = vcombine.low %v266_v56, %v267_v57  ;;  %v279_v61 = vrot.slane %v272_v58, %v278_v59 }
  0x68   :  { %v287_v62 = vrot.slane %v280_v60, %v278_v59 }
  0x6a   :  { %v292_v63 = vrot.slane %v287_v62, 7 }
  0x6c   :  { %v294_v0 = vsel %vm293_vm1, %v292_v63, %v279_v61 }
  0x6d   :  { %v296_v2 = vsel %vm295_vm2, %v292_v63, %v294_v0 }
  0x6e   :  { %v298_v4 = vsel %vm297_vm3, %v292_v63, %v296_v2 }
  0x6f   :  { %v300_v5 = vsel %vm299_vm4, %v292_v63, %v298_v4 }
  0x70   :  { %302 = vst [vmem:[#allocation7] sm:$0xf] %v300_v5 }
  0x71   :  { %421 = shalt.err (!%p418_p6)
}
  0x72   :  { %s422_s14 = scalar_lea.hbm %s655_s2, 64 }
  0x73   :  { %p423_p7 = scmp.ne.s32.totalorder %s655_s2, %s422_s14  ;;  %p426_p8 = scmp.lt.u32.totalorder %s422_s14, %s655_s2 }
  0x75   :  { %p428_p9 = pnand %p426_p8, %p423_p7 }
  0x77   :  { %431 = shalt.err (!%p428_p9)
}
  0x78   :  { %312 = dma.vmem_to_hbm [thread:$0]  %s310_s10, 64, %s655_s2, [#allocation4]  }
  0x79   :  { %s468_s21 = smov [#allocation8]  }
  0x7a   :  { %s319_s22 = sshll.u32 %s468_s21, 4  ;;  %s320_s22 = int_to_ptr.vmem [resolvable:$true] %s319_s22 }
  0x7b   :  { %s432_s24 = scalar_lea.vmem %s320_s22, 128  ;;  %p437_p11 = scmp.lt.s32.totalorder %s320_s22, %s320_s22 }
  0x7c   :  { %p433_p10 = scmp.ne.s32.totalorder %s320_s22, %s432_s24  ;;  %p438_p12 = scmp.lt.s32.totalorder %s432_s24, %s432_s24 }
  0x7e   :  { %p439_p13 = por %p438_p12, %p437_p11 }
  0x80   :  { %p440_p0 = pnand %p439_p13, %p433_p10 }
  0xc3   :  { %v66_v6 = vpop.xlane.xlu0 %65 }
  0xc4   :  { %v67_v7 = vrot.slane %v66_v6, 4 }
  0xc6   :  { %v68_v8 = vadd.f32 %v67_v7, %v66_v6 }
  0xc8   :  { %v69_v10 = vrot.slane %v68_v8, 2 }
  0xca   :  { %v70_v11 = vadd.f32 %v69_v10, %v68_v8 }
  0xcc   :  { %v71_v12 = vrot.slane %v70_v11, 1 }
  0xce   :  { %v72_v13 = vadd.f32 %v71_v12, %v70_v11 }
  0xd0   :  { %333 = vpush %v72_v13 }
 0x101   :  { %s334_s23 = spop %333 }
 0x102   :  { %v74_v15 = vstv %s334_s23 }
 0x103   :  { %75 = vst [vmem:[#allocation8] sm:$0xff] %v74_v15 }
 0x104   :  { %443 = shalt.err (!%p440_p0)
}
 0x105   :  { %s444_s26 = scalar_lea.hbm %s656_s3, 128 }
 0x106   :  { %p445_p1 = scmp.ne.s32.totalorder %s656_s3, %s444_s26  ;;  %p448_p2 = scmp.lt.u32.totalorder %s444_s26, %s656_s3 }
 0x108   :  { %p450_p3 = pnand %p448_p2, %p445_p1 }
 0x10a   :  { %453 = shalt.err (!%p450_p3)
}
 0x10b   :  { %322 = dma.vmem_to_hbm [thread:$0]  %s320_s22, 128, %s656_s3, [#allocation9]  }
 0x10c   :  { %458 = dma.done.wait [#allocation4], 64  }
 0x10d   :  { %459 = vsyncadd [#allocation4], 4294967232 }
 0x10e   :  { %460 = dma.done.wait [#allocation9], 128  }
 0x10f   :  { %461 = vsyncadd [#allocation9], 4294967168 }
 0x110   :  { %329 = vsyncpa [#allocation3], 1 }
 0x111   :  { %330 = vsyncpa [#allocation6], 1 }
 0x112   :  { %331 = vsyncpa [#allocation4], 1 }
 0x113   :  { %332 = vsyncpa [#allocation9], 1 }

</bundles_post_ra>
